<compile_context>
chip_gen: v5e
topology: v5e:2x2
jax: 0.10.0
libtpu: 0.0.40
codegen_flags: <defaults>
</compile_context>

<pallas_src>
import functools

import jax
import jax.numpy as jnp
from jax.experimental import pallas as pl
from jax.experimental.pallas import tpu as pltpu

_EPS = 1e-5


def _round_up(a, m):
    return ((a + m - 1) // m) * m


def _pad_last(x, target):
    pad = target - x.shape[-1]
    if pad == 0:
        return x
    return jnp.pad(x, ((0, 0), (0, 0), (0, pad)))


def _vmem_budget():
    """~82% of this generation's physical VMEM (leaves compile headroom)."""
    cap = 64 << 20                      # conservative fallback (v7x per-TC)
    try:
        cap = int(getattr(pltpu.get_tpu_info(), "vmem_capacity_bytes", cap))
    except Exception:
        pass
    return int(0.82 * cap)


# ---------------------------------------------------------------------------
# Fused kernels: GroupNorm(1, dim) + 1x1 Conv2d, normalization in the epilogue
# ---------------------------------------------------------------------------
def _fused_whole_kernel(x_ref, w_ref, b_ref, wsum_ref, o_ref, *, inv_n, eps):
    # x_ref: (C, HWp) raw activation (matmul dtype); w_ref: (Cout, C) folded
    # weights; b_ref/wsum_ref: (Cout, 1) f32 folded bias / row-sums of W_f.
    x = x_ref[...]
    # MXU matmul on the *raw* activation; independent of the stats below, so
    # it overlaps the VPU/XLU reductions instead of serializing behind them.
    acc = jnp.dot(w_ref[...], x, preferred_element_type=jnp.float32)
    xf = x.astype(jnp.float32)
    s = jnp.sum(xf)
    ss = jnp.sum(xf * xf)                 # zero-padding contributes 0 to both
    mean = s * inv_n                      # inv_n uses the *unpadded* count
    var = ss * inv_n - mean * mean        # biased variance (torch GroupNorm)
    inv = jax.lax.rsqrt(var + eps)
    # y = W_f @ (inv*(x-mean)) + b_f == inv*acc + (b_f - inv*mean*rowsum(W_f))
    o_ref[...] = (inv * acc + (b_ref[...] - (inv * mean) * wsum_ref[...])
                  ).astype(o_ref.dtype)


def _stats_kernel(x_ref, sum_ref, ssq_ref):
    # One (C, tHW) tile per step; f32 partial sums accumulate in the resident
    # (1, 1) output blocks (HW-tile axis is "arbitrary").
    @pl.when(pl.program_id(1) == 0)
    def _():
        sum_ref[...] = jnp.zeros_like(sum_ref)
        ssq_ref[...] = jnp.zeros_like(ssq_ref)

    xf = x_ref[...].astype(jnp.float32)     # per-tile cast only, no full copy
    sum_ref[...] += jnp.sum(xf, keepdims=True)
    ssq_ref[...] += jnp.sum(xf * xf, keepdims=True)


def _fused_apply_kernel(x_ref, w_ref, scale_ref, offset_ref, o_ref):
    # x_ref: (C, tHW) raw; w_ref: (Cout, C); scale_ref: (1,1) per-sample inv;
    # offset_ref: (Cout, 1) per-sample f32 = b_f - inv*mean*rowsum(W_f).
    acc = jnp.dot(w_ref[...], x_ref[...], preferred_element_type=jnp.float32)
    o_ref[...] = (scale_ref[...] * acc + offset_ref[...]).astype(o_ref.dtype)


def _pick_tile_hw(budget, C, Cout, x_item, out_item, w_item, hw128):
    resident = Cout * C * w_item + 2 * Cout * 4 + 4     # W_f + b_f + wsum
    avail = max(budget - resident - (4 << 20), 1 << 20)
    # bytes per lane column: x (double-buffered) + out (double-buffered)
    # + f32 matmul accumulator + f32 stats tile (covers the stats pass too).
    per_col = 2 * C * x_item + 2 * Cout * out_item + Cout * 4 + C * 4
    t = int(avail // per_col)
    t = max(128, (t // 128) * 128)
    # NOTE: if the trace still shows exposed DMA at small tiles, consider
    # pipeline_mode=pl.Buffered(3) on the x BlockSpec below.
    return min(t, 2048, hw128)


def prenorm_conv1x1(x_nchw, gn_weight, gn_bias, conv_w, conv_b, *,
                    matmul_dtype=None, force_tiled=False, tile_hw=None,
                    eps=_EPS):
    """Fused forward of PreNorm(dim, Conv2d(dim, dim_out, kernel_size=1))."""
    N, C, H, W = x_nchw.shape
    Cout = conv_w.shape[0]
    HW = H * W
    out_dtype = x_nchw.dtype
    mm_dtype = jnp.dtype(matmul_dtype if matmul_dtype is not None
                         else x_nchw.dtype)

    # Fold the GroupNorm per-channel affine into the (linear) 1x1 conv:
    #   W_f = W * gamma[None, :],   b_f = W @ beta + b.
    w32 = conv_w.astype(jnp.float32) * gn_weight.astype(jnp.float32)[None, :]
    b_f = (conv_w.astype(jnp.float32) @ gn_bias.astype(jnp.float32)
           + conv_b.astype(jnp.float32)).reshape(Cout, 1)
    w_f = w32.astype(mm_dtype)                            # MXU operand dtype
    # Row-sums (f32) of the weights actually fed to the MXU, used by the
    # normalization epilogue fold.
    wsum = jnp.sum(w_f.astype(jnp.float32), axis=1).reshape(Cout, 1)

    x = x_nchw.reshape(N, C, HW)
    if x.dtype != mm_dtype:
        x = x.astype(mm_dtype)      # also halves x's HBM traffic for f32→bf16

    budget = _vmem_budget()
    x_item = mm_dtype.itemsize
    out_item = jnp.dtype(out_dtype).itemsize
    hw128 = _round_up(HW, 128)
    inv_n = 1.0 / float(C * HW)              # actual (unpadded) element count

    # Whole-sample footprint: x/out double-buffered, weights resident once,
    # f32 matmul accumulator, f32 stats copy only when x is not already f32.
    resident = Cout * C * x_item + 2 * Cout * 4
    whole_need = (2 * C * hw128 * x_item + 2 * Cout * hw128 * out_item
                  + resident + Cout * hw128 * 4
                  + (C * hw128 * 4 if mm_dtype != jnp.float32 else 0)
                  + (2 << 20))
    use_whole = (not force_tiled) and tile_hw is None and whole_need <= budget

    if use_whole:
        # Single HBM round trip: one kernel per sample, stats + MXU fused.
        xp = _pad_last(x, hw128)
        out = pl.pallas_call(
            functools.partial(_fused_whole_kernel, inv_n=inv_n, eps=eps),
            out_shape=jax.ShapeDtypeStruct((N, Cout, hw128), out_dtype),
            grid_spec=pl.GridSpec(
                grid=(N,),
                in_specs=[
                    pl.BlockSpec((pl.Squeezed(), C, hw128), lambda i: (i, 0, 0)),
                    pl.BlockSpec((Cout, C), lambda i: (0, 0)),   # resident
                    pl.BlockSpec((Cout, 1), lambda i: (0, 0)),
                    pl.BlockSpec((Cout, 1), lambda i: (0, 0)),
                ],
                out_specs=pl.BlockSpec((pl.Squeezed(), Cout, hw128),
                                       lambda i: (i, 0, 0)),
            ),
            compiler_params=pltpu.CompilerParams(
                dimension_semantics=("parallel",),
                vmem_limit_bytes=budget),
        )(xp, w_f, b_f, wsum)
        return out[:, :, :HW].reshape(N, Cout, H, W)

    # --- tiled two-pass path (large C*HW, or forced) -----------------------
    if tile_hw is not None:
        t_hw = min(_round_up(int(tile_hw), 128), hw128)
    else:
        t_hw = _pick_tile_hw(budget, C, Cout, x_item, out_item, x_item, hw128)
    hw_pad = _round_up(HW, t_hw)
    n_hw = hw_pad // t_hw
    xp = _pad_last(x, hw_pad)

    # Pass 1: per-sample sum / sum-of-squares over HW tiles (f32 partials).
    ssum, ssq = pl.pallas_call(
        _stats_kernel,
        out_shape=(jax.ShapeDtypeStruct((N, 1, 1), jnp.float32),
                   jax.ShapeDtypeStruct((N, 1, 1), jnp.float32)),
        grid_spec=pl.GridSpec(
            grid=(N, n_hw),
            in_specs=[pl.BlockSpec((pl.Squeezed(), C, t_hw),
                                   lambda i, j: (i, 0, j))],
            out_specs=(pl.BlockSpec((pl.Squeezed(), 1, 1), lambda i, j: (i, 0, 0)),
                       pl.BlockSpec((pl.Squeezed(), 1, 1), lambda i, j: (i, 0, 0))),
        ),
        compiler_params=pltpu.CompilerParams(
            dimension_semantics=("parallel", "arbitrary"),
            vmem_limit_bytes=budget),
    )(xp)

    mean = ssum.reshape(N) * inv_n
    var = ssq.reshape(N) * inv_n - mean * mean
    inv = jax.lax.rsqrt(var + eps)
    scale = inv.reshape(N, 1, 1).astype(jnp.float32)
    offset = (b_f[None, :, :]
              - (inv * mean)[:, None, None] * wsum[None, :, :]
              ).astype(jnp.float32)

    # Pass 2: fused matmul + normalization epilogue; both grid axes parallel
    # (shards across both v7x TensorCores even at N == 1).
    out = pl.pallas_call(
        _fused_apply_kernel,
        out_shape=jax.ShapeDtypeStruct((N, Cout, hw_pad), out_dtype),
        grid_spec=pl.GridSpec(
            grid=(N, n_hw),
            in_specs=[
                pl.BlockSpec((pl.Squeezed(), C, t_hw), lambda i, j: (i, 0, j)),
                pl.BlockSpec((Cout, C), lambda i, j: (0, 0)),    # resident
                pl.BlockSpec((pl.Squeezed(), 1, 1), lambda i, j: (i, 0, 0)),
                pl.BlockSpec((pl.Squeezed(), Cout, 1), lambda i, j: (i, 0, 0)),
            ],
            out_specs=pl.BlockSpec((pl.Squeezed(), Cout, t_hw),
                                   lambda i, j: (i, 0, j)),
        ),
        compiler_params=pltpu.CompilerParams(
            dimension_semantics=("parallel", "parallel"),
            vmem_limit_bytes=budget),
    )(xp, w_f, scale, offset)
    return out[:, :, :HW].reshape(N, Cout, H, W)


# ---------------------------------------------------------------------------
# Generic path: standalone GroupNorm(1, dim) kernel + arbitrary JAX fn.
# (No affine fold here -- only valid when fn is linear.)  NOTE: this costs an
# extra HBM round trip; route 1x1-conv uses through prenorm_conv1x1.
# ---------------------------------------------------------------------------
def _groupnorm1_kernel(x_ref, w_ref, b_ref, o_ref, *, inv_n, eps):
    x = x_ref[...].astype(jnp.float32)
    s = jnp.sum(x)
    ss = jnp.sum(x * x)
    mean = s * inv_n
    var = ss * inv_n - mean * mean
    inv = jax.lax.rsqrt(var + eps)
    o_ref[...] = (((x - mean) * inv) * w_ref[...] + b_ref[...]).astype(o_ref.dtype)


def groupnorm1(x_nchw, weight_c, bias_c, *, eps=_EPS):
    N, C, H, W = x_nchw.shape
    HW = H * W
    hw128 = _round_up(HW, 128)
    x = _pad_last(x_nchw.reshape(N, C, HW), hw128)
    w = weight_c.reshape(C, 1).astype(jnp.float32)
    b = bias_c.reshape(C, 1).astype(jnp.float32)
    budget = _vmem_budget()
    # TODO(synk): tile HW (as in prenorm_conv1x1) when a whole padded sample
    # (double-buffered, plus its f32 stats copy) exceeds the VMEM budget.
    out = pl.pallas_call(
        functools.partial(_groupnorm1_kernel, inv_n=1.0 / float(C * HW), eps=eps),
        out_shape=jax.ShapeDtypeStruct((N, C, hw128), x_nchw.dtype),
        grid_spec=pl.GridSpec(
            grid=(N,),
            in_specs=[
                pl.BlockSpec((pl.Squeezed(), C, hw128), lambda i: (i, 0, 0)),
                pl.BlockSpec((C, 1), lambda i: (0, 0)),
                pl.BlockSpec((C, 1), lambda i: (0, 0)),
            ],
            out_specs=pl.BlockSpec((pl.Squeezed(), C, hw128), lambda i: (i, 0, 0)),
        ),
        compiler_params=pltpu.CompilerParams(
            dimension_semantics=("parallel",),
            vmem_limit_bytes=budget),
    )(x, w, b)
    return out[:, :, :HW].reshape(N, C, H, W)


def _conv1x1_kernel(x_ref, w_ref, b_ref, o_ref):
    y = jnp.dot(w_ref[...], x_ref[...], preferred_element_type=jnp.float32)
    o_ref[...] = (y + b_ref[...]).astype(o_ref.dtype)


def conv1x1(x_nchw, weight_oc_ic, bias_o):
    N, C, H, W = x_nchw.shape
    Cout = weight_oc_ic.shape[0]
    HW = H * W
    hw128 = _round_up(HW, 128)
    x = _pad_last(x_nchw.reshape(N, C, HW), hw128)
    w = weight_oc_ic.astype(x_nchw.dtype)
    b = bias_o.reshape(Cout, 1).astype(jnp.float32)
    budget = _vmem_budget()
    out = pl.pallas_call(
        _conv1x1_kernel,
        out_shape=jax.ShapeDtypeStruct((N, Cout, hw128), x_nchw.dtype),
        grid_spec=pl.GridSpec(
            grid=(N,),
            in_specs=[
                pl.BlockSpec((pl.Squeezed(), C, hw128), lambda i: (i, 0, 0)),
                pl.BlockSpec((Cout, C), lambda i: (0, 0)),
                pl.BlockSpec((Cout, 1), lambda i: (0, 0)),
            ],
            out_specs=pl.BlockSpec((pl.Squeezed(), Cout, hw128),
                                   lambda i: (i, 0, 0)),
        ),
        compiler_params=pltpu.CompilerParams(
            dimension_semantics=("parallel",),
            vmem_limit_bytes=budget),
    )(x, w, b)
    return out[:, :, :HW].reshape(N, Cout, H, W)


def prenorm(x, gn_weight, gn_bias, fn):
    """Generic PreNorm: y = fn(GroupNorm1(x)), fn is any JAX callable."""
    return fn(groupnorm1(x, gn_weight, gn_bias))


if __name__ == "__main__":
    key = jax.random.PRNGKey(0)
    N, C, H, W = 2, 4, 16, 16
    Cout = C
    k_x, k_gw, k_gb, k_w, k_b = jax.random.split(key, 5)

    x = jax.random.normal(k_x, (N, C, H, W), dtype=jnp.float32)
    gn_weight = 1.0 + 0.1 * jax.random.normal(k_gw, (C,), dtype=jnp.float32)
    gn_bias = 0.1 * jax.random.normal(k_gb, (C,), dtype=jnp.float32)
    conv_w = 0.1 * jax.random.normal(k_w, (Cout, C), dtype=jnp.float32)
    conv_b = 0.1 * jax.random.normal(k_b, (Cout,), dtype=jnp.float32)

    # Pure-JAX reference: GroupNorm(1, C) followed by the 1x1 conv.
    xr = x.reshape(N, -1)
    mean = xr.mean(axis=1, keepdims=True)
    var = ((xr - mean) ** 2).mean(axis=1, keepdims=True)
    xn = ((xr - mean) / jnp.sqrt(var + _EPS)).reshape(N, C, H, W)
    xn = xn * gn_weight.reshape(1, C, 1, 1) + gn_bias.reshape(1, C, 1, 1)
    ref = jnp.einsum("oc,nchw->nohw", conv_w, xn) + conv_b.reshape(1, Cout, 1, 1)

    # 1) Fused single-kernel path (whole-sample, epilogue-folded norm).
    y = jax.block_until_ready(
        prenorm_conv1x1(x, gn_weight, gn_bias, conv_w, conv_b))
    assert y.shape == ref.shape
    assert jnp.allclose(y, ref, atol=1e-4, rtol=1e-4)

    # 2) Tiled two-pass path (stats pre-pass + fused apply), multiple HW tiles.
    y_t = jax.block_until_ready(
        prenorm_conv1x1(x, gn_weight, gn_bias, conv_w, conv_b,
                        force_tiled=True, tile_hw=128))
    assert jnp.allclose(y_t, ref, atol=1e-4, rtol=1e-4)

    # 3) bf16 MXU-operand path (f32 accumulation) -- looser tolerance.
    y_bf = jax.block_until_ready(
        prenorm_conv1x1(x, gn_weight, gn_bias, conv_w, conv_b,
                        matmul_dtype=jnp.bfloat16))
    assert jnp.allclose(y_bf.astype(jnp.float32), ref, atol=3e-2, rtol=3e-2)

    # 4) Generic PreNorm path (arbitrary fn; no affine fold).
    fn = functools.partial(conv1x1, weight_oc_ic=conv_w, bias_o=conv_b)
    y_g = jax.block_until_ready(prenorm(x, gn_weight, gn_bias, fn))
    assert jnp.allclose(y_g, ref, atol=1e-4, rtol=1e-4)

    print("KERNEL_OK")
</pallas_src>

<mosaic_0001>
module attributes {stable_mosaic.version = 11 : i64} {
  func.func @_fused_whole_kernel(%arg0: i32, %arg1: memref<1x4x256xf32, #tpu.memory_space<vmem>>, %arg2: memref<4x4xf32, #tpu.memory_space<vmem>>, %arg3: memref<4x1xf32, #tpu.memory_space<vmem>>, %arg4: memref<4x1xf32, #tpu.memory_space<vmem>>, %arg5: memref<1x4x256xf32, #tpu.memory_space<vmem>>) attributes {dimension_semantics = [#tpu.dimension_semantics<parallel>], iteration_bounds = array<i64: 2>, scalar_prefetch = 0 : i64, scratch_operands = 0 : i64, tpu.core_type = #tpu.core_type<tc>, window_params = [{transform_indices = @transform_0, window_bounds = array<i64: 1, 4, 256>}, {pipeline_mode = #tpu.pipeline_mode<synchronous>, transform_indices = @transform_1, window_bounds = array<i64: 4, 4>}, {pipeline_mode = #tpu.pipeline_mode<synchronous>, transform_indices = @transform_2, window_bounds = array<i64: 4, 1>}, {pipeline_mode = #tpu.pipeline_mode<synchronous>, transform_indices = @transform_3, window_bounds = array<i64: 4, 1>}, {transform_indices = @transform_4, window_bounds = array<i64: 1, 4, 256>}]} {
    %c0 = arith.constant 0 : index
    %c0_0 = arith.constant 0 : index
    %c0_1 = arith.constant 0 : index
    %0 = vector.load %arg1[%c0, %c0_0, %c0_1] : memref<1x4x256xf32, #tpu.memory_space<vmem>>, vector<1x4x256xf32>
    %1 = vector.shape_cast %0 : vector<1x4x256xf32> to vector<4x256xf32>
    %c0_2 = arith.constant 0 : index
    %c0_3 = arith.constant 0 : index
    %2 = vector.load %arg2[%c0_2, %c0_3] : memref<4x4xf32, #tpu.memory_space<vmem>>, vector<4x4xf32>
    %cst = arith.constant dense<0.000000e+00> : vector<4x256xf32>
    %3 = tpu.matmul %2, %1, %cst {dimension_numbers = #tpu.dot_dimension_numbers<[1], [0], [0], [1], [0, 0, 1, 1], [], []>} : vector<4x4xf32>, vector<4x256xf32>, vector<4x256xf32> -> vector<4x256xf32>
    %4 = vector.shape_cast %1 : vector<4x256xf32> to vector<1x4x256xf32>
    %cst_4 = arith.constant dense<0.000000e+00> : vector<1xf32>
    %5 = vector.multi_reduction <add>, %4, %cst_4 [1, 2] : vector<1x4x256xf32> to vector<1xf32>
    %6 = vector.shape_cast %5 : vector<1xf32> to vector<1x1x1xf32>
    %7 = vector.extract %6[0, 0, 0] : f32 from vector<1x1x1xf32>
    %8 = arith.mulf %1, %1 : vector<4x256xf32>
    %9 = vector.shape_cast %8 : vector<4x256xf32> to vector<1x4x256xf32>
    %cst_5 = arith.constant dense<0.000000e+00> : vector<1xf32>
    %10 = vector.multi_reduction <add>, %9, %cst_5 [1, 2] : vector<1x4x256xf32> to vector<1xf32>
    %11 = vector.shape_cast %10 : vector<1xf32> to vector<1x1x1xf32>
    %12 = vector.extract %11[0, 0, 0] : f32 from vector<1x1x1xf32>
    %cst_6 = arith.constant 9.765625E-4 : f32
    %13 = arith.mulf %7, %cst_6 : f32
    %cst_7 = arith.constant 9.765625E-4 : f32
    %14 = arith.mulf %12, %cst_7 : f32
    %15 = arith.mulf %13, %13 : f32
    %16 = arith.subf %14, %15 : f32
    %cst_8 = arith.constant 9.99999974E-6 : f32
    %17 = arith.addf %16, %cst_8 : f32
    %18 = math.rsqrt %17 : f32
    %19 = vector.broadcast %18 : f32 to vector<4x256xf32>
    %20 = arith.mulf %19, %3 : vector<4x256xf32>
    %c0_9 = arith.constant 0 : index
    %c0_10 = arith.constant 0 : index
    %21 = vector.load %arg3[%c0_9, %c0_10] : memref<4x1xf32, #tpu.memory_space<vmem>>, vector<4x1xf32>
    %22 = arith.mulf %18, %13 : f32
    %c0_11 = arith.constant 0 : index
    %c0_12 = arith.constant 0 : index
    %23 = vector.load %arg4[%c0_11, %c0_12] : memref<4x1xf32, #tpu.memory_space<vmem>>, vector<4x1xf32>
    %24 = vector.broadcast %22 : f32 to vector<4x1xf32>
    %25 = arith.mulf %24, %23 : vector<4x1xf32>
    %26 = arith.subf %21, %25 : vector<4x1xf32>
    %27 = vector.broadcast %26 : vector<4x1xf32> to vector<4x256xf32>
    %28 = arith.addf %20, %27 : vector<4x256xf32>
    %c0_13 = arith.constant 0 : index
    %c0_14 = arith.constant 0 : index
    %c0_15 = arith.constant 0 : index
    %29 = vector.load %arg5[%c0_13, %c0_14, %c0_15] : memref<1x4x256xf32, #tpu.memory_space<vmem>>, vector<1x4x256xf32>
    %30 = vector.shape_cast %29 : vector<1x4x256xf32> to vector<4x256xf32>
    %31 = vector.shape_cast %28 : vector<4x256xf32> to vector<1x4x256xf32>
    tpu.vector_store %arg5[%c0_13, %c0_14, %c0_15], %31 {strides = array<i32>} : memref<1x4x256xf32, #tpu.memory_space<vmem>>, vector<1x4x256xf32>,
    return
  }
  func.func @transform_0(%arg0: i32) -> (i32, i32, i32) {
    %c0_i32 = arith.constant 0 : i32
    %c0_i32_0 = arith.constant 0 : i32
    %c0_i32_1 = arith.constant 0 : i32
    return %arg0, %c0_i32, %c0_i32_0 : i32, i32, i32
  }
  func.func @transform_1(%arg0: i32) -> (i32, i32) {
    %c0_i32 = arith.constant 0 : i32
    %c0_i32_0 = arith.constant 0 : i32
    %c0_i32_1 = arith.constant 0 : i32
    return %c0_i32, %c0_i32_0 : i32, i32
  }
  func.func @transform_2(%arg0: i32) -> (i32, i32) {
    %c0_i32 = arith.constant 0 : i32
    %c0_i32_0 = arith.constant 0 : i32
    %c0_i32_1 = arith.constant 0 : i32
    return %c0_i32, %c0_i32_0 : i32, i32
  }
  func.func @transform_3(%arg0: i32) -> (i32, i32) {
    %c0_i32 = arith.constant 0 : i32
    %c0_i32_0 = arith.constant 0 : i32
    %c0_i32_1 = arith.constant 0 : i32
    return %c0_i32, %c0_i32_0 : i32, i32
  }
  func.func @transform_4(%arg0: i32) -> (i32, i32, i32) {
    %c0_i32 = arith.constant 0 : i32
    %c0_i32_0 = arith.constant 0 : i32
    %c0_i32_1 = arith.constant 0 : i32
    return %arg0, %c0_i32, %c0_i32_0 : i32, i32, i32
  }
}

</mosaic_0001>

<bundles_post_ra>
// kernel: tpu_custom_call.1
= control target key start
LH: loop header
LB: loop body
LE: loop exit
PB: predicated region body
PF: predicated region fallthrough
CT: control target
= control target key end

     0   :  { %9 = vsyncpa [#allocation3], 0  ;;  %s781_s0 = inlined_call_operand.hbm [shape: f32[2,4,256], index: 0, kind: input, shape index: {}]   ;;  %s782_s1 = inlined_call_operand.vmem [shape: f32[4,4], index: 1, kind: input, shape index: {}]   ;;  %s783_s2 = inlined_call_operand.vmem [shape: f32[4,1], index: 2, kind: input, shape index: {}]   ;;  %s784_s3 = inlined_call_operand.vmem [shape: f32[4,1], index: 3, kind: input, shape index: {}]   ;;  %s785_s4 = inlined_call_operand.hbm [shape: f32[2,4,256], index: 4, kind: output, shape index: {}]  }
   0x1   :  { %11 = vsyncpa [#allocation3 + $0x1], 0 }
   0x2   :  { %12 = vsyncpa [#allocation4], 0 }
   0x3   :  { %14 = vsyncpa [#allocation4 + $0x1], 0  ;;  %s634_s15 = smov 0   ;;  %s636_s16 = smov 0  }
   0x4   :  { %s638_s17 = smov 0   ;;  %s640_s18 = smov 0  }
   0x5 LB: > { %s655_s19 = sadd.s32 4294967295, %s606_s18   ;;  %s433_s20 = sadd.s32 4294967294, %s606_s18   ;;  %s606_s18 = sphi %s640_s18, %s795_s18   ;;  %s602_s17 = sphi %s638_s17, %s794_s17   ;;  %s598_s16 = sphi %s636_s16, %s793_s16   ;;  %s594_s15 = sphi %s634_s15, %s792_s15  }
   0x6   : > { %s659_s21 = sadd.s32 1, %s606_s18   ;;  %s27_s22 = sadd.s32 1, %s602_s17 }
   0x7   : > { %s24_s23 = ssub.s32 %s606_s18, %s659_s21  ;;  %p34_p0 = scmp.ne.s32.totalorder %s602_s17, %s598_s16 }
   0x8   : > { %p25_p1 = scmp.eq.s32.totalorder %s24_s23, 0  ;;  %p35_p2 = scmp.eq.s32.totalorder %s606_s18, 0 }
   0x9   : > { %p40_p3 = scmp.ne.s32.totalorder %s598_s16, %s594_s15  ;;  %p41_p4 = scmp.eq.s32.totalorder %s655_s19, 0 }
   0xa   : > { %s671_s24 = scalar_select %p25_p1, %s602_s17, %s27_s22  }
   0xb   : > { %p673_p5 = por %p35_p2, %p34_p0  ;;  %p677_p6 = por %p41_p4, %p40_p3 }
   0xc   : > { %p127_p7 = scmp.eq.s32.totalorder %s655_s19, 1  ;;  %p133_p8 = scmp.eq.s32.totalorder %s433_s20, 1 }
   0xd   : > { %p471_p10 = scmp.lt.s32.totalorder %s606_s18, 2  ;;  %s162_s29 = sand.u32 1, %s602_s17  }
   0xe   : > { %p684_p11 = por %p127_p7, %p34_p0  ;;  %p688_p12 = por %p133_p8, %p40_p3 }
   0xf   : > { %s451_s30 = sshll.u32 %s606_s18, 3  ;;  %s436_s5 = sshll.u32 %s162_s29, 3 }
  0x10   : > { %s171_s8 = scalar_lea.hbm %s781_s0, %s451_s30  ;;  %s166_s10 = scalar_lea.vmem [#allocation2], %s436_s5 }
  0x11   : > { %s173_s9 = sshll.u32 %s171_s8, 4  ;;  %s175_s11 = sshll.u32 %s166_s10, 4  ;;  %s174_s9 = int_to_ptr.hbm [resolvable:$true] %s173_s9  ;;  %s176_s11 = int_to_ptr.vmem [resolvable:$true] %s175_s11 }
  0x12   : > { %p699_p13 = pnand %p471_p10, %p673_p5  ;;  %p439_p0 = scmp.ge.s32.totalorder %s606_s18, 1 }
  0x13   : > { %p180_p1 = scmp.lt.s32.totalorder %s606_s18, 3  ;;  %s163_s13 = scalar_lea.sflag [#allocation3], %s162_s29 }
  0x14   : > { %s510_s14 = sshra.s32 %s174_s9, 4  ;;  %p514_p3 = pneg %p699_p13  ;;  %s511_s14 = int_to_ptr.hbm [resolvable:$true] %s510_s14 }
  0x15   : > { %s512_s20 = scalar_lea.hbm %s511_s14, 8  ;;  %s517_s25 = scalar_lea.hbm %s781_s0, 16 }
  0x16   : > { %p513_p2 = scmp.ne.s32.totalorder %s511_s14, %s512_s20  ;;  %p518_p5 = scmp.lt.s32.totalorder %s511_s14, %s781_s0 }
  0x17   : > { %p519_p8 = scmp.lt.s32.totalorder %s517_s25, %s512_s20 }
  0x18   : > { %p515_p4 = pnand %p514_p3, %p513_p2 }
  0x19   : > { %p520_p10 = por %p519_p8, %p518_p5 }
  0x1a   : > { %p516_p7 = pneg %p515_p4 }
  0x1c   : > { %p521_p9 = pnand %p520_p10, %p516_p7 }
  0x1e   : > { %524 = shalt.err (!%p521_p9)
}
  0x1f   : > { %466 = dma.hbm_to_vmem [thread:$0]  (!%p699_p13), %s174_s9, 128, %s176_s11, %s163_s13  }
  0x20   : > { %p181_p2 = pnand %p439_p0, %p180_p1 }
  0x21   : > { %s720_s29 = sand.u32 (!%p181_p2), 1, %s598_s16  }
  0x22   : > { %184 = sbr.rel (%p181_p2) target bundleno = 451 (0x1c3), region = 36  ;;  %s440_s6 = sshll.u32 (!%p181_p2), %s720_s29, 3 }
  0x23   : > { %s187_s7 = scalar_lea.sflag (!%p181_p2), [#allocation3], %s720_s29  ;;  %s190_s8 = scalar_lea.vmem (!%p181_p2), [#allocation2], %s440_s6 }
  0x27   : > { %585 = dma.done.wait (%p677_p6), %s187_s7, 128  }
  0x28   : > { %587 = vsyncadd (%p677_p6), %s187_s7, 4294967168  ;;  %v216_v0 = vld [vmem:[%s190_s8] sm:$0xff]  ;;  %vm226_vm0 = vcmask 1043456   ;;  %v217_v14 = vld [vmem:[%s782_s1] sm:$0xf]  ;;  %vm222_vm1 = vcmask 31744  }
  0x29   : > { %219 = vst [vmem:[#allocation1] ss:$2 sm:$0xff] %v216_v0  ;;  %v288_v3 = vmul.f32 %v216_v0, %v216_v0  ;;  %v608_v37 = vmov 0   ;;  %v329_v38 = vld [vmem:[%s784_s3] sm:$0xf]  ;;  %s452_s26 = sshll.u32 %s655_s19, 3 }
  0x2a   : > { %506 = vset.pattern.permute.xlu1 %v608_v37  ;;  %507 = vset.pattern.permute.xlu0 %v608_v37  ;;  %v327_v40 = vld [vmem:[%s783_s2] sm:$0xf]  ;;  %s347_s19 = scalar_lea.sflag [#allocation4], %s720_s29 }
  0x30   : > { %v220_v1 = vld.sshfl [vmem:[#allocation1] sm:$0xff pattern:$0x75316420]  ;;  %v221_v2 = vld.sshfl [vmem:[#allocation1 + $0x8] sm:$0xff pattern:$0x75316420] }
  0x31   : > { %271 = vst [vmem:[#allocation1] ss:$2 sm:$0xff] %v216_v0  ;;  %442 = vmatpush.msk.msra.mxu0 %vm226_vm0, %v220_v1  ;;  %444 = vmatpush.msk.msra.mxu1 %vm226_vm0, %v221_v2 }
  0x32   : > { %443 = vmatmul.msk.f32.vlgmr.msra.gmra.mxu0 %vm222_vm1, %v217_v14  ;;  %445 = vmatmul.msk.f32.vlgmr.msra.gmra.mxu1 %vm222_vm1, %v217_v14 }
  0x38   : > { %v272_v4 = vld.sshfl [vmem:[#allocation1] sm:$0xff pattern:$0x75316420]  ;;  %v273_v5 = vld.sshfl [vmem:[#allocation1 + $0x8] sm:$0xff pattern:$0x75316420] }
  0x39   : > { %v276_v6 = vsel %vm226_vm0, %v272_v4, 0.0  ;;  %v277_v7 = vsel %vm226_vm0, %v273_v5, 0.0  ;;  %290 = vst [vmem:[#allocation1] ss:$2 sm:$0xff] %v288_v3 }
  0x3a   : > { %v278_v8 = vadd.f32 %v277_v7, %v276_v6 }
  0x3c   : > { %279 = vadd.xlane.f32.xlu0 %v278_v8 }
  0x40   : > { %v291_v9 = vld.sshfl [vmem:[#allocation1] sm:$0xff pattern:$0x75316420]  ;;  %v292_v10 = vld.sshfl [vmem:[#allocation1 + $0x8] sm:$0xff pattern:$0x75316420] }
  0x41   : > { %v295_v11 = vsel %vm226_vm0, %v291_v9, 0.0  ;;  %v296_v12 = vsel %vm226_vm0, %v292_v10, 0.0 }
  0x42   : > { %v297_v13 = vadd.f32 %v296_v12, %v295_v11 }
  0x44   : > { %298 = vadd.xlane.f32.xlu0 %v297_v13 }
  0xaf   : > { %v280_v15 = vpop.xlane.xlu0 %279  ;;  %v268_v44 = vpop.f32.mrf.mxu1 }
  0xb0   : > { %v281_v16 = vrot.slane %v280_v15, 4  ;;  %v248_v45 = vpop.f32.mrf.mxu0 }
  0xb2   : > { %v282_v17 = vadd.f32 %v281_v16, %v280_v15 }
  0xb4   : > { %v283_v18 = vrot.slane %v282_v17, 2 }
  0xb6   : > { %v284_v19 = vadd.f32 %v283_v18, %v282_v17 }
  0xb7   : > { %v299_v20 = vpop.xlane.xlu0 %298 }
  0xb8   : > { %v300_v21 = vrot.slane %v299_v20, 4  ;;  %v285_v22 = vrot.slane %v284_v19, 1 }
  0xba   : > { %v301_v23 = vadd.f32 %v300_v21, %v299_v20  ;;  %v286_v24 = vadd.f32 %v285_v22, %v284_v19 }
  0xbc   : > { %v302_v25 = vrot.slane %v301_v23, 2  ;;  %453 = vpush %v286_v24 }
  0xbe   : > { %v303_v26 = vadd.f32 %v302_v25, %v301_v23 }
  0xc0   : > { %v304_v27 = vrot.slane %v303_v26, 1 }
  0xc2   : > { %v305_v28 = vadd.f32 %v304_v27, %v303_v26 }
  0xc4   : > { %455 = vpush %v305_v28 }
  0xed   : > { %s454_s10 = spop %453 }
  0xee   : > { %s307_s11 = smul.f32 0.0009765625, %s454_s10 }
  0xf0   : > { %s309_s12 = smul.f32 %s307_s11, %s307_s11 }
  0xf5   : > { %s456_s13 = spop %455 }
  0xf6   : > { %s308_s14 = smul.f32 0.0009765625, %s456_s13 }
  0xf8   : > { %s310_s20 = ssub.f32 %s308_s14, %s309_s12  ;;  %s215_s12 = scalar_lea.vmem [#allocation5], %s440_s6 }
  0xf9   : > { %s360_s13 = sshll.u32 %s215_s12, 4  ;;  %s560_s6 = scalar_lea.hbm %s785_s4, 16  ;;  %s361_s13 = int_to_ptr.vmem [resolvable:$true] %s360_s13 }
  0xfa   : > { %s311_s22 = sadd.f32 1e-05, %s310_s20 }
  0xfc   : > { %v312_v29 = vstv %s311_s22 }
  0xfd   : > { %508 = vrsqrt.f32 %v312_v29  ;;  %vm319_vm3 = vweird.f32 %v312_v29 }
 0x103   : > { %v509_v30 = vpop.eup %508 }
 0x104   : > { %v314_v31 = vmul.f32 %v509_v30, %v312_v29  ;;  %vm320_vm2 = vweird.f32 %v509_v30 }
 0x105   : > { %vm321_vm4 = vmor %vm319_vm3, %vm320_vm2 }
 0x106   : > { %v315_v32 = vmul.f32 %v509_v30, %v314_v31 }
 0x108   : > { %v316_v33 = vmul.f32 0.5, %v315_v32 }
 0x10a   : > { %v317_v34 = vsub.f32 1.5, %v316_v33 }
 0x10c   : > { %v318_v35 = vmul.f32 %v509_v30, %v317_v34 }
 0x10e   : > { %v322_v36 = vsel %vm321_vm4, %v509_v30, %v318_v35 }
 0x10f   : > { %457 = vpush %v322_v36 }
 0x140   : > { %s458_s23 = spop %457 }
 0x141   : > { %s328_s25 = smul.f32 %s458_s23, %s307_s11  ;;  %v324_v43 = vstv %s458_s23  ;;  %s358_s11 = scalar_lea.hbm %s785_s4, %s452_s26 }
 0x142   : > { %v326_v46 = vmul.f32 %v324_v43, %v268_v44  ;;  %v325_v48 = vmul.f32 %v324_v43, %v248_v45  ;;  %s362_s14 = sshll.u32 %s358_s11, 4  ;;  %s363_s14 = int_to_ptr.hbm [resolvable:$true] %s362_s14 }
 0x143   : > { %v330_v39 = vstv %s328_s25  ;;  %s554_s20 = sshra.s32 %s363_s14, 4  ;;  %s555_s20 = int_to_ptr.hbm [resolvable:$true] %s554_s20 }
 0x144   : > { %v331_v41 = vmul.f32 %v330_v39, %v329_v38  ;;  %s556_s22 = scalar_lea.hbm %s555_s20, 8  ;;  %p561_p0 = scmp.lt.s32.totalorder %s555_s20, %s785_s4 }
 0x145   : > { %p557_p6 = scmp.ne.s32.totalorder %s555_s20, %s556_s22  ;;  %p562_p1 = scmp.lt.s32.totalorder %s560_s6, %s556_s22 }
 0x146   : > { %v332_v42 = vsub.f32 %v327_v40, %v331_v41 }
 0x147   : > { %p558_p9 = pnand %p557_p6, %p684_p11  ;;  %p563_p3 = por %p562_p1, %p561_p0 }
 0x148   : > { %335 = vperm.xlu1 %506, %v332_v42  }
 0x149   : > { %p559_p13 = pneg %p558_p9 }
 0x14b   : > { %p564_p4 = pnand %p563_p3, %p559_p13 }
 0x1ba   : > { %v336_v47 = vpop.permute.xlu1 %335 }
 0x1bb   : > { %v339_v49 = vadd.f32 %v336_v47, %v326_v46  ;;  %v338_v50 = vadd.f32 %v336_v47, %v325_v48 }
 0x1bd   : > { %v342_v51 = vrot.slane %v339_v49, 4 }
 0x1bf   : > { %v343_v52 = vsel %vm226_vm0, %v338_v50, %v342_v51 }
 0x1c0   : > { %345 = vst [vmem:[%s215_s12] sm:$0xff] %v343_v52 }
 0x1c1   : > { %567 = shalt.err (!%p564_p4)
}
 0x1c2   : > { %461 = dma.vmem_to_hbm [thread:$0]  (%p684_p11), %s361_s13, 128, %s363_s14, %s347_s19  }
 0x1c3 PF: > { %s374_s29 = sand.u32 1, %s594_s15   ;;  %p791_p7 = scmp.ge.s32.totalorder %s606_s18, 2 }
 0x1c4   : > { %s375_s7 = scalar_lea.sflag [#allocation4], %s374_s29 }
 0x1c5   : > { %p468_p5 = pnand %p791_p7, %p688_p12 }
 0x1c7   : > { %p469_p8 = pneg %p468_p5 }
 0x1c9   : > { %589 = dma.done.wait (%p469_p8), %s375_s7, 128  }
 0x1ca   : > { %591 = vsyncadd (%p469_p8), %s375_s7, 4294967168  ;;  %p17_p10 = scmp.ge.s32.totalorder %s659_s21, 4   ;;  %s792_s15 = smov %s598_s16 }
 0x1cb   : > { %s793_s16 = smov %s602_s17  ;;  %s794_s17 = smov %s671_s24 }
 0x1cc   : > { %s795_s18 = smov %s659_s21  ;;  %19 = sbr.rel (!%p17_p10) target bundleno = 5 (0x5), region = 81 }
 0x1d1   :  { %381 = vsyncpa [#allocation3], 1 }
 0x1d2   :  { %383 = vsyncpa [#allocation3 + $0x1], 1 }
 0x1d3   :  { %384 = vsyncpa [#allocation4], 1 }
 0x1d4   :  { %386 = vsyncpa [#allocation4 + $0x1], 1 }

</bundles_post_ra>
